<compile_context>
chip_gen: v5e
topology: v5e:2x2
jax: 0.10.0
libtpu: 0.0.40
codegen_flags: <defaults>
</compile_context>

<pallas_src>
import functools

import jax
import jax.numpy as jnp
from jax.experimental import pallas as pl
from jax.experimental.pallas import tpu as pltpu

_LANE = 128


def _round_up(n, m):
    return ((n + m - 1) // m) * m


def _fused_mlp_kernel(*refs, layer_cfg, eps):
    """refs = (x_ref, [w_ref, gamma_ref, beta_ref] * nLayer, o_ref).

    layer_cfg: tuple of (use_bn: bool, act: str) per layer (static).
    All math in f32; matmuls accumulate in f32 on the MXU. The whole chain
    stays in VMEM/vregs (single invocation, no grid).
    """
    x_ref = refs[0]
    o_ref = refs[-1]
    param_refs = refs[1:-1]

    y = x_ref[...]
    for li, (use_bn, act) in enumerate(layer_cfg):
        w_ref = param_refs[3 * li + 0]
        g_ref = param_refs[3 * li + 1]
        b_ref = param_refs[3 * li + 2]

        y = jnp.dot(y, w_ref[...], preferred_element_type=jnp.float32)

        if use_bn:
            mean = jnp.mean(y, axis=0, keepdims=True)           # (1, F)
            centered = y - mean                                  # reused below
            var = jnp.mean(centered * centered, axis=0, keepdims=True)
            scale = g_ref[...] * jax.lax.rsqrt(var + eps)        # fold gamma
            y = centered * scale + b_ref[...]

        if act == "relu":
            y = jnp.maximum(y, 0.0)
        elif act == "tanh":
            y = jnp.tanh(y)
        elif act == "sigmoid":
            y = jax.nn.sigmoid(y)
        # 'linear' / None -> identity

    o_ref[...] = y.astype(o_ref.dtype)


class FusedMLP:
    """MLP.forward(x) (shortcut=None) as one fused Pallas kernel.

    All parameter padding to 128 lanes happens once here; __call__ only pads
    the input batch's feature axis and slices the lane-dense output.
    """

    def __init__(self, params, acts, *, bn, linear_last, i_size, eps=1e-5):
        n = len(params)
        self.eps = float(eps)
        self.in_dim = int(i_size)
        self.in_pad = _round_up(self.in_dim, _LANE)

        padded = []
        layer_cfg = []
        flops_per_row = 0       # matmul flops per batch row (padded dims)
        param_bytes = 0
        prev_dim, prev_pad = self.in_dim, self.in_pad
        for i, p in enumerate(params):
            out_dim = p["w_t"].shape[1]
            out_pad = _round_up(out_dim, _LANE)
            # Zero-pad weights on both axes: padded input rows multiply padded
            # (zero) activation cols; padded output cols stay identically 0.
            w_p = jnp.pad(p["w_t"], ((0, prev_pad - prev_dim),
                                     (0, out_pad - out_dim)))
            g_p = jnp.pad(p["gamma"], ((0, 0), (0, out_pad - out_dim)),
                          constant_values=1.0)
            b_p = jnp.pad(p["beta"], ((0, 0), (0, out_pad - out_dim)))
            padded += [w_p, g_p, b_p]

            # PyTorch module: BN suppressed only on the last layer when
            # linear=='True'; activation always follows getActivation(act[i]).
            use_bn = bn and not (linear_last and i == n - 1)
            act = acts[i] if acts[i] is not None else "linear"
            layer_cfg.append((use_bn, act))

            flops_per_row += 2 * prev_pad * out_pad
            param_bytes += (w_p.size + g_p.size + b_p.size) * 4
            prev_dim, prev_pad = out_dim, out_pad

        self.padded_params = tuple(padded)
        self.layer_cfg = tuple(layer_cfg)
        self.out_dim, self.out_pad = prev_dim, prev_pad
        self._flops_per_row = flops_per_row
        self._param_bytes = param_bytes
        self._n_bn = sum(1 for (u, _) in layer_cfg if u)

        self._kernel = functools.partial(
            _fused_mlp_kernel, layer_cfg=self.layer_cfg, eps=self.eps)
        self._forward = jax.jit(self._forward_impl)

    def _forward_impl(self, x, *padded_params):
        B = x.shape[0]
        x_p = jnp.pad(x, ((0, 0), (0, self.in_pad - x.shape[1])))

        vmem_spec = pl.BlockSpec(memory_space=pltpu.MemorySpace.VMEM)
        n_in = 1 + len(padded_params)

        io_bytes = (B * self.in_pad + B * self.out_pad) * 4 + self._param_bytes
        cost = pl.CostEstimate(
            flops=B * self._flops_per_row,
            transcendentals=self._n_bn * self.out_pad,   # rsqrt per BN feature
            bytes_accessed=io_bytes,
        )
        # I/O + a few live BxLANE activation slabs, 2x margin; cap at 64 MiB
        # so the same limit is legal on v7x (64 MiB physical VMEM per TC).
        vmem_need = 2 * (io_bytes + 4 * 4 * B * _LANE)
        vmem_limit = int(min(64 << 20, max(vmem_need, 4 << 20)))

        out_padded = pl.pallas_call(
            self._kernel,
            out_shape=jax.ShapeDtypeStruct((B, self.out_pad), x.dtype),
            in_specs=[vmem_spec] * n_in,
            out_specs=vmem_spec,
            cost_estimate=cost,
            compiler_params=pltpu.CompilerParams(
                vmem_limit_bytes=vmem_limit),
        )(x_p, *padded_params)
        return out_padded[:, :self.out_dim]

    def __call__(self, x):
        return self._forward(x, *self.padded_params)


def init_mlp_params(key, i_size, f_size):
    """Deterministic parameter init mimicking nn.Linear (uniform, no bias)
    and fresh BatchNorm1d (gamma=1, beta=0)."""
    params = []
    in_dim = i_size
    for out_dim in f_size:
        key, sub = jax.random.split(key)
        bound = 1.0 / jnp.sqrt(jnp.asarray(in_dim, jnp.float32))
        w = jax.random.uniform(sub, (out_dim, in_dim), jnp.float32,
                               minval=-bound, maxval=bound)
        params.append({
            "w_t": jnp.transpose(w),                       # (in, out)
            "gamma": jnp.ones((1, out_dim), jnp.float32),
            "beta": jnp.zeros((1, out_dim), jnp.float32),
        })
        in_dim = out_dim
    return params


if __name__ == "__main__":
    # netData-equivalent config (small shapes).
    net_data = {
        "nLayer": 3,
        "fSize": [32, 32, 16],
        "act": ["relu", "relu", "linear"],
        "BN": "True",
        "linear": "True",
    }
    i_size = 4
    batch = 8

    key = jax.random.PRNGKey(0)
    key_p, key_x = jax.random.split(key)
    params = init_mlp_params(key_p, i_size, net_data["fSize"])
    x = jax.random.normal(key_x, (batch, i_size), jnp.float32)

    bn_flag = net_data["BN"] == "True"
    linear_flag = net_data["linear"] == "True"

    mlp = FusedMLP(params, net_data["act"], bn=bn_flag,
                   linear_last=linear_flag, i_size=i_size)

    out = mlp(x)
    out = jax.block_until_ready(out)

    # Pure-JAX reference matching the PyTorch module's semantics exactly.
    def ref_forward(x):
        n = len(params)
        for i, p in enumerate(params):
            y = x @ p["w_t"]
            if bn_flag and not (linear_flag and i == n - 1):
                m = jnp.mean(y, axis=0, keepdims=True)
                v = jnp.mean((y - m) ** 2, axis=0, keepdims=True)
                y = (y - m) / jnp.sqrt(v + 1e-5)
                y = y * p["gamma"] + p["beta"]
            a = net_data["act"][i]
            if a == "relu":
                y = jnp.maximum(y, 0.0)
            elif a == "tanh":
                y = jnp.tanh(y)
            elif a == "sigmoid":
                y = jax.nn.sigmoid(y)
            x = y
        return x

    ref = ref_forward(x)
    assert out.shape == (batch, net_data["fSize"][-1])
    assert jnp.allclose(out, ref, atol=1e-5, rtol=1e-5)

    print("KERNEL_OK")
</pallas_src>

<mosaic_0001>
module attributes {stable_mosaic.version = 11 : i64} {
  func.func @_fused_mlp_kernel(%arg0: memref<8x128xf32, #tpu.memory_space<vmem>>, %arg1: memref<128x128xf32, #tpu.memory_space<vmem>>, %arg2: memref<1x128xf32, #tpu.memory_space<vmem>>, %arg3: memref<1x128xf32, #tpu.memory_space<vmem>>, %arg4: memref<128x128xf32, #tpu.memory_space<vmem>>, %arg5: memref<1x128xf32, #tpu.memory_space<vmem>>, %arg6: memref<1x128xf32, #tpu.memory_space<vmem>>, %arg7: memref<128x128xf32, #tpu.memory_space<vmem>>, %arg8: memref<1x128xf32, #tpu.memory_space<vmem>>, %arg9: memref<1x128xf32, #tpu.memory_space<vmem>>, %arg10: memref<8x128xf32, #tpu.memory_space<vmem>>) attributes {dimension_semantics = [], scalar_prefetch = 0 : i64, scratch_operands = 0 : i64, tpu.core_type = #tpu.core_type<tc>} {
    %c0 = arith.constant 0 : index
    %c0_0 = arith.constant 0 : index
    %0 = vector.load %arg0[%c0, %c0_0] : memref<8x128xf32, #tpu.memory_space<vmem>>, vector<8x128xf32>
    %c0_1 = arith.constant 0 : index
    %c0_2 = arith.constant 0 : index
    %1 = vector.load %arg1[%c0_1, %c0_2] : memref<128x128xf32, #tpu.memory_space<vmem>>, vector<128x128xf32>
    %cst = arith.constant dense<0.000000e+00> : vector<8x128xf32>
    %2 = tpu.matmul %0, %1, %cst {dimension_numbers = #tpu.dot_dimension_numbers<[1], [0], [0], [1], [0, 0, 1, 1], [], []>} : vector<8x128xf32>, vector<128x128xf32>, vector<8x128xf32> -> vector<8x128xf32>
    %cst_3 = arith.constant dense<0.000000e+00> : vector<128xf32>
    %3 = vector.multi_reduction <add>, %2, %cst_3 [0] : vector<8x128xf32> to vector<128xf32>
    %4 = vector.shape_cast %3 : vector<128xf32> to vector<1x128xf32>
    %cst_4 = arith.constant 8.000000e+00 : f32
    %5 = vector.broadcast %cst_4 : f32 to vector<1x128xf32>
    %6 = arith.divf %4, %5 : vector<1x128xf32>
    %7 = vector.broadcast %6 : vector<1x128xf32> to vector<8x128xf32>
    %8 = arith.subf %2, %7 : vector<8x128xf32>
    %9 = arith.mulf %8, %8 : vector<8x128xf32>
    %cst_5 = arith.constant dense<0.000000e+00> : vector<128xf32>
    %10 = vector.multi_reduction <add>, %9, %cst_5 [0] : vector<8x128xf32> to vector<128xf32>
    %11 = vector.shape_cast %10 : vector<128xf32> to vector<1x128xf32>
    %cst_6 = arith.constant 8.000000e+00 : f32
    %12 = vector.broadcast %cst_6 : f32 to vector<1x128xf32>
    %13 = arith.divf %11, %12 : vector<1x128xf32>
    %c0_7 = arith.constant 0 : index
    %c0_8 = arith.constant 0 : index
    %14 = vector.load %arg2[%c0_7, %c0_8] : memref<1x128xf32, #tpu.memory_space<vmem>>, vector<1x128xf32>
    %cst_9 = arith.constant 9.99999974E-6 : f32
    %15 = vector.broadcast %cst_9 : f32 to vector<1x128xf32>
    %16 = arith.addf %13, %15 : vector<1x128xf32>
    %17 = math.rsqrt %16 : vector<1x128xf32>
    %18 = arith.mulf %14, %17 : vector<1x128xf32>
    %19 = vector.broadcast %18 : vector<1x128xf32> to vector<8x128xf32>
    %20 = arith.mulf %8, %19 : vector<8x128xf32>
    %c0_10 = arith.constant 0 : index
    %c0_11 = arith.constant 0 : index
    %21 = vector.load %arg3[%c0_10, %c0_11] : memref<1x128xf32, #tpu.memory_space<vmem>>, vector<1x128xf32>
    %22 = vector.broadcast %21 : vector<1x128xf32> to vector<8x128xf32>
    %23 = arith.addf %20, %22 : vector<8x128xf32>
    %cst_12 = arith.constant 0.000000e+00 : f32
    %24 = vector.broadcast %cst_12 : f32 to vector<8x128xf32>
    %25 = arith.maximumf %23, %24 : vector<8x128xf32>
    %c0_13 = arith.constant 0 : index
    %c0_14 = arith.constant 0 : index
    %26 = vector.load %arg4[%c0_13, %c0_14] : memref<128x128xf32, #tpu.memory_space<vmem>>, vector<128x128xf32>
    %cst_15 = arith.constant dense<0.000000e+00> : vector<8x128xf32>
    %27 = tpu.matmul %25, %26, %cst_15 {dimension_numbers = #tpu.dot_dimension_numbers<[1], [0], [0], [1], [0, 0, 1, 1], [], []>} : vector<8x128xf32>, vector<128x128xf32>, vector<8x128xf32> -> vector<8x128xf32>
    %cst_16 = arith.constant dense<0.000000e+00> : vector<128xf32>
    %28 = vector.multi_reduction <add>, %27, %cst_16 [0] : vector<8x128xf32> to vector<128xf32>
    %29 = vector.shape_cast %28 : vector<128xf32> to vector<1x128xf32>
    %cst_17 = arith.constant 8.000000e+00 : f32
    %30 = vector.broadcast %cst_17 : f32 to vector<1x128xf32>
    %31 = arith.divf %29, %30 : vector<1x128xf32>
    %32 = vector.broadcast %31 : vector<1x128xf32> to vector<8x128xf32>
    %33 = arith.subf %27, %32 : vector<8x128xf32>
    %34 = arith.mulf %33, %33 : vector<8x128xf32>
    %cst_18 = arith.constant dense<0.000000e+00> : vector<128xf32>
    %35 = vector.multi_reduction <add>, %34, %cst_18 [0] : vector<8x128xf32> to vector<128xf32>
    %36 = vector.shape_cast %35 : vector<128xf32> to vector<1x128xf32>
    %cst_19 = arith.constant 8.000000e+00 : f32
    %37 = vector.broadcast %cst_19 : f32 to vector<1x128xf32>
    %38 = arith.divf %36, %37 : vector<1x128xf32>
    %c0_20 = arith.constant 0 : index
    %c0_21 = arith.constant 0 : index
    %39 = vector.load %arg5[%c0_20, %c0_21] : memref<1x128xf32, #tpu.memory_space<vmem>>, vector<1x128xf32>
    %cst_22 = arith.constant 9.99999974E-6 : f32
    %40 = vector.broadcast %cst_22 : f32 to vector<1x128xf32>
    %41 = arith.addf %38, %40 : vector<1x128xf32>
    %42 = math.rsqrt %41 : vector<1x128xf32>
    %43 = arith.mulf %39, %42 : vector<1x128xf32>
    %44 = vector.broadcast %43 : vector<1x128xf32> to vector<8x128xf32>
    %45 = arith.mulf %33, %44 : vector<8x128xf32>
    %c0_23 = arith.constant 0 : index
    %c0_24 = arith.constant 0 : index
    %46 = vector.load %arg6[%c0_23, %c0_24] : memref<1x128xf32, #tpu.memory_space<vmem>>, vector<1x128xf32>
    %47 = vector.broadcast %46 : vector<1x128xf32> to vector<8x128xf32>
    %48 = arith.addf %45, %47 : vector<8x128xf32>
    %cst_25 = arith.constant 0.000000e+00 : f32
    %49 = vector.broadcast %cst_25 : f32 to vector<8x128xf32>
    %50 = arith.maximumf %48, %49 : vector<8x128xf32>
    %c0_26 = arith.constant 0 : index
    %c0_27 = arith.constant 0 : index
    %51 = vector.load %arg7[%c0_26, %c0_27] : memref<128x128xf32, #tpu.memory_space<vmem>>, vector<128x128xf32>
    %cst_28 = arith.constant dense<0.000000e+00> : vector<8x128xf32>
    %52 = tpu.matmul %50, %51, %cst_28 {dimension_numbers = #tpu.dot_dimension_numbers<[1], [0], [0], [1], [0, 0, 1, 1], [], []>} : vector<8x128xf32>, vector<128x128xf32>, vector<8x128xf32> -> vector<8x128xf32>
    %c0_29 = arith.constant 0 : index
    %c0_30 = arith.constant 0 : index
    %53 = vector.load %arg10[%c0_29, %c0_30] : memref<8x128xf32, #tpu.memory_space<vmem>>, vector<8x128xf32>
    tpu.vector_store %arg10[%c0_29, %c0_30], %52 {strides = array<i32>} : memref<8x128xf32, #tpu.memory_space<vmem>>, vector<8x128xf32>,
    return
  }
}

</mosaic_0001>

<bundles_post_ra>
// kernel: _forward_impl.1
= control target key start
LH: loop header
LB: loop body
LE: loop exit
PB: predicated region body
PF: predicated region fallthrough
CT: control target
= control target key end

     0   :  { %15 = vsyncpa [#allocation3], 0  ;;  %s508_s0 = inlined_call_operand.vmem [shape: f32[8,128], index: 0, kind: input, shape index: {}]   ;;  %s509_s1 = inlined_call_operand.hbm [shape: f32[128,128], index: 1, kind: input, shape index: {}]   ;;  %s510_s2 = inlined_call_operand.vmem [shape: f32[1,128], index: 2, kind: input, shape index: {}]   ;;  %s511_s3 = inlined_call_operand.vmem [shape: f32[1,128], index: 3, kind: input, shape index: {}]   ;;  %s512_s4 = inlined_call_operand.hbm [shape: f32[128,128], index: 4, kind: input, shape index: {}]   ;;  %s513_s5 = inlined_call_operand.vmem [shape: f32[1,128], index: 5, kind: input, shape index: {}]   ;;  %s514_s6 = inlined_call_operand.vmem [shape: f32[1,128], index: 6, kind: input, shape index: {}]   ;;  %s515_s7 = inlined_call_operand.hbm [shape: f32[128,128], index: 7, kind: input, shape index: {}]   ;;  %s516_s8 = inlined_call_operand.vmem [shape: f32[1,128], index: 8, kind: input, shape index: {}]   ;;  %s517_s9 = inlined_call_operand.vmem [shape: f32[1,128], index: 9, kind: input, shape index: {}]   ;;  %s518_s10 = inlined_call_operand.hbm [shape: f32[8,128], index: 10, kind: output, shape index: {}]  }
   0x1   :  { %16 = vsyncpa [#allocation6], 0 }
   0x2   :  { %17 = vsyncpa [#allocation4], 0  ;;  %s41_s15 = sshll.u32 %s512_s4, 4  ;;  %s413_s16 = smov [#allocation5]   ;;  %s42_s15 = int_to_ptr.hbm [resolvable:$true] %s41_s15 }
   0x3   :  { %s43_s17 = sshll.u32 %s413_s16, 4  ;;  %s24_s8 = sshll.u32 %s509_s1, 4  ;;  %s44_s17 = int_to_ptr.vmem [resolvable:$true] %s43_s17  ;;  %s25_s8 = int_to_ptr.hbm [resolvable:$true] %s24_s8 }
   0x4   :  { %s414_s20 = smov 128   ;;  %s415_s9 = smov 8  }
   0x5   :  { %49 = dma.hbm_to_vmem [thread:$0]  %s42_s15, 2048, %s44_s17, [#allocation6], %s414_s20, %s414_s20, %s415_s9  }
   0x6   :  { %s416_s21 = smov [#allocation2]   ;;  %s58_s25 = sshll.u32 %s515_s7, 4  ;;  %s59_s25 = int_to_ptr.hbm [resolvable:$true] %s58_s25 }
   0x7   :  { %s26_s22 = sshll.u32 %s416_s21, 4  ;;  %s417_s4 = smov [#allocation7]   ;;  %s27_s22 = int_to_ptr.vmem [resolvable:$true] %s26_s22 }
   0x8   :  { %32 = dma.hbm_to_vmem [thread:$0]  %s25_s8, 2048, %s27_s22, [#allocation3], %s414_s20, %s414_s20, %s415_s9  }
   0x9   :  { %s60_s26 = sshll.u32 %s417_s4, 4  ;;  %s61_s26 = int_to_ptr.vmem [resolvable:$true] %s60_s26 }
   0xa   :  { %66 = dma.hbm_to_vmem [thread:$0]  %s59_s25, 2048, %s61_s26, [#allocation6], %s414_s20, %s414_s20, %s415_s9  }
   0xb   :  { %407 = dma.done.wait [#allocation3], 2048  }
   0xc   :  { %408 = vsyncadd [#allocation3], 4294965248 }
   0xd   :  { %409 = dma.done.wait [#allocation6], 4096  }
   0xe   :  { %410 = vsyncadd [#allocation6], 4294963200  ;;  %v99_v0 = vld [vmem:[#allocation2 + $0x78] sm:$0xff]  ;;  %v98_v1 = vld [vmem:[#allocation2 + $0x70] sm:$0xff]  ;;  %v418_v17 = vmov 8.0   ;;  %s419_s12 = smov [#allocation8]  }
   0xf   :  { %100 = vmatpush.msra.mxu0 %v99_v0  ;;  %v97_v2 = vld [vmem:[#allocation2 + $0x68] sm:$0xff]  ;;  %v96_v3 = vld [vmem:[#allocation2 + $0x60] sm:$0xff]  ;;  %v95_v4 = vld [vmem:[#allocation2 + $0x58] sm:$0xff]  ;;  %305 = vrcp.f32 %v418_v17  ;;  %s283_s13 = sshll.u32 %s419_s12, 4  ;;  %s284_s13 = int_to_ptr.vmem [resolvable:$true] %s283_s13 }
  0x10   :  { %v94_v5 = vld [vmem:[#allocation2 + $0x50] sm:$0xff]  ;;  %v93_v6 = vld [vmem:[#allocation2 + $0x48] sm:$0xff]  ;;  %v92_v7 = vld [vmem:[#allocation2 + $0x40] sm:$0xff] }
  0x11   :  { %101 = vmatpush.msra.mxu0 %v98_v1  ;;  %v91_v8 = vld [vmem:[#allocation2 + $0x38] sm:$0xff]  ;;  %v90_v9 = vld [vmem:[#allocation2 + $0x30] sm:$0xff]  ;;  %v89_v10 = vld [vmem:[#allocation2 + $0x28] sm:$0xff] }
  0x12   :  { %v88_v11 = vld [vmem:[#allocation2 + $0x20] sm:$0xff]  ;;  %v87_v12 = vld [vmem:[#allocation2 + $0x18] sm:$0xff]  ;;  %v86_v13 = vld [vmem:[#allocation2 + $0x10] sm:$0xff] }
  0x13   :  { %102 = vmatpush.msra.mxu0 %v97_v2  ;;  %v85_v14 = vld [vmem:[#allocation2 + $0x8] sm:$0xff]  ;;  %v84_v15 = vld [vmem:[#allocation2] sm:$0xff]  ;;  %v181_v21 = vld [vmem:[#allocation5 + $0x78] sm:$0xff] }
  0x14   :  { %v83_v16 = vld [vmem:[%s508_s0] sm:$0xff]  ;;  %182 = vmatpush.msra.mxu1 %v181_v21  ;;  %v180_v24 = vld [vmem:[#allocation5 + $0x70] sm:$0xff]  ;;  %v179_v27 = vld [vmem:[#allocation5 + $0x68] sm:$0xff] }
  0x15   :  { %103 = vmatpush.msra.mxu0 %v96_v3  ;;  %v306_v18 = vpop.eup %305  ;;  %v178_v29 = vld [vmem:[#allocation5 + $0x60] sm:$0xff]  ;;  %v177_v32 = vld [vmem:[#allocation5 + $0x58] sm:$0xff]  ;;  %v176_v34 = vld [vmem:[#allocation5 + $0x50] sm:$0xff] }
  0x16   :  { %v127_v19 = vmul.f32 8.0, %v306_v18  ;;  %183 = vmatpush.msra.mxu1 %v180_v24  ;;  %vm131_vm0 = vweird.f32 %v306_v18  ;;  %v175_v37 = vld [vmem:[#allocation5 + $0x48] sm:$0xff]  ;;  %v174_v39 = vld [vmem:[#allocation5 + $0x40] sm:$0xff]  ;;  %v173_v41 = vld [vmem:[#allocation5 + $0x38] sm:$0xff] }
  0x17   :  { %104 = vmatpush.msra.mxu0 %v95_v4  ;;  %v172_v43 = vld [vmem:[#allocation5 + $0x30] sm:$0xff]  ;;  %v171_v45 = vld [vmem:[#allocation5 + $0x28] sm:$0xff]  ;;  %v170_v47 = vld [vmem:[#allocation5 + $0x20] sm:$0xff] }
  0x18   :  { %v128_v20 = vsub.f32 1.0, %v127_v19  ;;  %184 = vmatpush.msra.mxu1 %v179_v27  ;;  %v169_v49 = vld [vmem:[#allocation5 + $0x18] sm:$0xff]  ;;  %v168_v51 = vld [vmem:[#allocation5 + $0x10] sm:$0xff]  ;;  %v167_v52 = vld [vmem:[#allocation5 + $0x8] sm:$0xff] }
  0x19   :  { %105 = vmatpush.msra.mxu0 %v94_v5  ;;  %v166_v54 = vld [vmem:[#allocation5] sm:$0xff]  ;;  %v252_v17 = vld [vmem:[#allocation7 + $0x58] sm:$0xff]  ;;  %v251_v19 = vld [vmem:[#allocation7 + $0x50] sm:$0xff] }
  0x1a   :  { %v129_v25 = vmul.f32 %v306_v18, %v128_v20  ;;  %185 = vmatpush.msra.mxu1 %v178_v29  ;;  %v143_v63 = vld [vmem:[%s510_s2] sm:$0x1]  ;;  %v250_v21 = vld [vmem:[#allocation7 + $0x48] sm:$0xff]  ;;  %v247_v27 = vld [vmem:[#allocation7 + $0x30] sm:$0xff] }
  0x1b   :  { %106 = vmatpush.msra.mxu0 %v93_v6  ;;  %v303_v4 = vld [vmem:[%s511_s3] ss:$0 sm:$0xff]  ;;  %v246_v29 = vld [vmem:[#allocation7 + $0x28] sm:$0xff] }
  0x1c   :  { %v130_v30 = vadd.f32 %v306_v18, %v129_v25  ;;  %186 = vmatpush.msra.mxu1 %v177_v32  ;;  %v248_v25 = vld [vmem:[#allocation7 + $0x38] sm:$0xff] }
  0x1d   :  { %107 = vmatpush.msra.mxu0 %v92_v7 }
  0x1e   :  { %v487_v35 = vsel %vm131_vm0, %v306_v18, %v130_v30  ;;  %187 = vmatpush.msra.mxu1 %v176_v34 }
  0x1f   :  { %108 = vmatpush.msra.mxu0 %v91_v8  ;;  %v256_v8 = vld [vmem:[#allocation7 + $0x78] sm:$0xff] }
  0x20   :  { %188 = vmatpush.msra.mxu1 %v175_v37  ;;  %257 = vmatpush.msra.mxu2 %v256_v8  ;;  %v242_v37 = vld [vmem:[#allocation7 + $0x8] sm:$0xff] }
  0x21   :  { %109 = vmatpush.msra.mxu0 %v90_v9 }
  0x22   :  { %189 = vmatpush.msra.mxu1 %v174_v39  ;;  %v241_v39 = vld [vmem:[#allocation7] sm:$0xff] }
  0x23   :  { %110 = vmatpush.msra.mxu0 %v89_v10 }
  0x24   :  { %190 = vmatpush.msra.mxu1 %v173_v41 }
  0x25   :  { %111 = vmatpush.msra.mxu0 %v88_v11  ;;  %v255_v11 = vld [vmem:[#allocation7 + $0x70] sm:$0xff] }
  0x26   :  { %191 = vmatpush.msra.mxu1 %v172_v43  ;;  %258 = vmatpush.msra.mxu2 %v255_v11 }
  0x27   :  { %112 = vmatpush.msra.mxu0 %v87_v12 }
  0x28   :  { %192 = vmatpush.msra.mxu1 %v171_v45 }
  0x29   :  { %113 = vmatpush.msra.mxu0 %v86_v13  ;;  %v254_v13 = vld [vmem:[#allocation7 + $0x68] sm:$0xff] }
  0x2a   :  { %193 = vmatpush.msra.mxu1 %v170_v47  ;;  %259 = vmatpush.msra.mxu2 %v254_v13 }
  0x2b   :  { %114 = vmatpush.msra.mxu0 %v85_v14 }
  0x2c   :  { %194 = vmatpush.msra.mxu1 %v169_v49 }
  0x2d   :  { %115 = vmatpush.msra.mxu0 %v84_v15  ;;  %v253_v15 = vld [vmem:[#allocation7 + $0x60] sm:$0xff] }
  0x2e   :  { %116 = vmatmul.f32.vlgmr.msra.gmra.mxu0 %v83_v16  ;;  %195 = vmatpush.msra.mxu1 %v168_v51 }
  0x2f   :  { %260 = vmatpush.msra.mxu2 %v253_v15 }
  0x30   :  { %196 = vmatpush.msra.mxu1 %v167_v52 }
  0x31   :  { %261 = vmatpush.msra.mxu2 %v252_v17 }
  0x32   :  { %197 = vmatpush.msra.mxu1 %v166_v54 }
  0x33   :  { %262 = vmatpush.msra.mxu2 %v251_v19 }
  0x35   :  { %263 = vmatpush.msra.mxu2 %v250_v21 }
  0xab   :  { %v117_v22 = vpop.f32.mrf.mxu0 }
  0xac   :  { %v120_v23 = vrot.slane %v117_v22, 4 }
  0xae   :  { %v121_v26 = vadd.f32 %v120_v23, %v117_v22  ;;  %v249_v23 = vld [vmem:[#allocation7 + $0x40] sm:$0xff] }
  0xaf   :  { %264 = vmatpush.msra.mxu2 %v249_v23 }
  0xb0   :  { %v122_v28 = vrot.slane %v121_v26, 2 }
  0xb1   :  { %265 = vmatpush.msra.mxu2 %v248_v25 }
  0xb2   :  { %v123_v31 = vadd.f32 %v122_v28, %v121_v26 }
  0xb3   :  { %266 = vmatpush.msra.mxu2 %v247_v27 }
  0xb4   :  { %v124_v33 = vrot.slane %v123_v31, 1 }
  0xb5   :  { %267 = vmatpush.msra.mxu2 %v246_v29 }
  0xb6   :  { %v125_v36 = vadd.f32 %v124_v33, %v123_v31  ;;  %v245_v31 = vld [vmem:[#allocation7 + $0x20] sm:$0xff]  ;;  %v244_v33 = vld [vmem:[#allocation7 + $0x18] sm:$0xff] }
  0xb7   :  { %268 = vmatpush.msra.mxu2 %v245_v31 }
  0xb8   :  { %v133_v38 = vmul.f32 %v487_v35, %v125_v36  ;;  %v243_v36 = vld [vmem:[#allocation7 + $0x10] sm:$0xff] }
  0xb9   :  { %269 = vmatpush.msra.mxu2 %v244_v33 }
  0xba   :  { %v134_v40 = vsub.f32 %v117_v22, %v133_v38 }
  0xbb   :  { %270 = vmatpush.msra.mxu2 %v243_v36 }
  0xbc   :  { %v135_v42 = vmul.f32 %v134_v40, %v134_v40 }
  0xbd   :  { %271 = vmatpush.msra.mxu2 %v242_v37 }
  0xbe   :  { %v136_v44 = vrot.slane %v135_v42, 4 }
  0xbf   :  { %272 = vmatpush.msra.mxu2 %v241_v39 }
  0xc0   :  { %v137_v46 = vadd.f32 %v136_v44, %v135_v42 }
  0xc2   :  { %v138_v48 = vrot.slane %v137_v46, 2 }
  0xc4   :  { %v139_v50 = vadd.f32 %v138_v48, %v137_v46  ;;  %v218_v48 = vld [vmem:[%s513_s5] sm:$0x1]  ;;  %s285_s5 = sshll.u32 %s518_s10, 4  ;;  %s286_s5 = int_to_ptr.hbm [resolvable:$true] %s285_s5 }
  0xc6   :  { %v140_v53 = vrot.slane %v139_v50, 1 }
  0xc8   :  { %v141_v55 = vadd.f32 %v140_v53, %v139_v50 }
  0xca   :  { %v142_v56 = vmul.f32 %v141_v55, %v487_v35 }
  0xcc   :  { %v144_v57 = vadd.f32 1e-05, %v142_v56 }
  0xce   :  { %307 = vrsqrt.f32 %v144_v57  ;;  %vm151_vm2 = vweird.f32 %v144_v57 }
  0xd4   :  { %v308_v58 = vpop.eup %307 }
  0xd5   :  { %v146_v59 = vmul.f32 %v308_v58, %v144_v57  ;;  %vm152_vm1 = vweird.f32 %v308_v58 }
  0xd6   :  { %vm153_vm3 = vmor %vm151_vm2, %vm152_vm1 }
  0xd7   :  { %v147_v60 = vmul.f32 %v308_v58, %v146_v59 }
  0xd9   :  { %v148_v61 = vmul.f32 0.5, %v147_v60 }
  0xdb   :  { %v149_v62 = vsub.f32 1.5, %v148_v61 }
  0xdd   :  { %v150_v0 = vmul.f32 %v308_v58, %v149_v62 }
  0xdf   :  { %v154_v1 = vsel %vm153_vm3, %v308_v58, %v150_v0 }
  0xe0   :  { %v155_v2 = vmul.f32 %v154_v1, %v143_v63 }
  0xe2   :  { %v157_v3 = vperm.slane %v155_v2, 0 }
  0xe4   :  { %v159_v5 = vmul.f32 %v157_v3, %v134_v40 }
  0xe6   :  { %v164_v6 = vadd.f32 %v303_v4, %v159_v5 }
  0xe8   :  { %v165_v7 = vmax.f32 %v164_v6, 0.0 }
  0xea   :  { %198 = vmatmul.f32.vlgmr.msra.gmra.mxu1 %v165_v7 }
 0x167   :  { %v199_v9 = vpop.f32.mrf.mxu1 }
 0x168   :  { %v202_v10 = vrot.slane %v199_v9, 4 }
 0x16a   :  { %v203_v12 = vadd.f32 %v202_v10, %v199_v9 }
 0x16c   :  { %v204_v14 = vrot.slane %v203_v12, 2 }
 0x16e   :  { %v205_v16 = vadd.f32 %v204_v14, %v203_v12 }
 0x170   :  { %v206_v18 = vrot.slane %v205_v16, 1 }
 0x172   :  { %v207_v20 = vadd.f32 %v206_v18, %v205_v16 }
 0x174   :  { %v208_v22 = vmul.f32 %v207_v20, %v487_v35 }
 0x176   :  { %v209_v24 = vsub.f32 %v199_v9, %v208_v22 }
 0x178   :  { %v210_v26 = vmul.f32 %v209_v24, %v209_v24 }
 0x17a   :  { %v211_v28 = vrot.slane %v210_v26, 4 }
 0x17c   :  { %v212_v30 = vadd.f32 %v211_v28, %v210_v26 }
 0x17e   :  { %v213_v32 = vrot.slane %v212_v30, 2 }
 0x180   :  { %v214_v34 = vadd.f32 %v213_v32, %v212_v30 }
 0x182   :  { %v215_v38 = vrot.slane %v214_v34, 1 }
 0x184   :  { %v216_v40 = vadd.f32 %v215_v38, %v214_v34 }
 0x186   :  { %v217_v41 = vmul.f32 %v216_v40, %v487_v35  ;;  %v304_v35 = vld [vmem:[%s514_s6] ss:$0 sm:$0xff] }
 0x188   :  { %v219_v42 = vadd.f32 1e-05, %v217_v41 }
 0x18a   :  { %309 = vrsqrt.f32 %v219_v42  ;;  %vm226_vm5 = vweird.f32 %v219_v42 }
 0x190   :  { %v310_v43 = vpop.eup %309 }
 0x191   :  { %v221_v44 = vmul.f32 %v310_v43, %v219_v42  ;;  %vm227_vm4 = vweird.f32 %v310_v43 }
 0x192   :  { %vm228_vm6 = vmor %vm226_vm5, %vm227_vm4 }
 0x193   :  { %v222_v45 = vmul.f32 %v310_v43, %v221_v44 }
 0x195   :  { %v223_v46 = vmul.f32 0.5, %v222_v45 }
 0x197   :  { %v224_v47 = vsub.f32 1.5, %v223_v46 }
 0x199   :  { %v225_v49 = vmul.f32 %v310_v43, %v224_v47 }
 0x19b   :  { %v229_v50 = vsel %vm228_vm6, %v310_v43, %v225_v49 }
 0x19c   :  { %v230_v51 = vmul.f32 %v229_v50, %v218_v48 }
 0x19e   :  { %v232_v52 = vperm.slane %v230_v51, 0 }
 0x1a0   :  { %v234_v53 = vmul.f32 %v232_v52, %v209_v24 }
 0x1a2   :  { %v239_v54 = vadd.f32 %v304_v35, %v234_v53 }
 0x1a4   :  { %v240_v55 = vmax.f32 %v239_v54, 0.0 }
 0x1a6   :  { %273 = vmatmul.f32.vlgmr.msra.gmra.mxu2 %v240_v55 }
 0x229   :  { %v274_v56 = vpop.f32.mrf.mxu2 }
 0x22a   :  { %277 = vst [vmem:[#allocation8] sm:$0xff] %v274_v56 }
 0x22b   :  { %288 = dma.vmem_to_hbm [thread:$0]  %s284_s13, 128, %s286_s5, [#allocation4]  }
 0x22c   :  { %411 = dma.done.wait [#allocation4], 128  }
 0x22d   :  { %412 = vsyncadd [#allocation4], 4294967168 }
 0x22e   :  { %293 = vsyncpa [#allocation3], 1 }
 0x22f   :  { %294 = vsyncpa [#allocation6], 1 }
 0x230   :  { %295 = vsyncpa [#allocation4], 1 }

</bundles_post_ra>
